<compile_context>
chip_gen: v5e
topology: v5e:2x2
jax: 0.10.0
libtpu: 0.0.40
codegen_flags: <defaults>
</compile_context>

<pallas_src>
import jax
import jax.numpy as jnp
import numpy as np
from jax import lax
from jax.experimental import pallas as pl
from jax.experimental.pallas import tpu as pltpu

BOARD = 16            # board_size of the (synthetic) internal model
CIN = 4               # input feature planes
HID = 32              # hidden conv channels
HW = BOARD * BOARD
BATCH = 2


# ----------------------------- Pallas kernel ------------------------------- #
def _policy_head_kernel(x_ref, w1t_ref, b1_ref, w2t_ref, b2_ref, o_ref):
    # x_ref  : (K, M)   im2col input, K = 9*CIN (taps*channels), M = N*H*W on lanes
    # w1t_ref: (Hf, K)  3x3-conv weights, transposed (Hf = HID or 2*HID fused)
    # b1_ref : (Hf, 1)  conv bias (broadcast over lanes)
    # w2t_ref: (1, Hf)  1x1 policy-head weights, transposed (averaging pre-folded)
    # b2_ref : (1,)     scalar head bias, SMEM
    # o_ref  : (1, M)   lane-dense per-cell logits
    h = jnp.dot(w1t_ref[...], x_ref[...], preferred_element_type=jnp.float32)
    h = jnp.maximum(h + b1_ref[...], 0.0)                         # bias + ReLU (VPU)
    out = jnp.dot(w2t_ref[...], h, preferred_element_type=jnp.float32) + b2_ref[0]
    o_ref[...] = out


def _run_policy_head(x_cols, w1t, b1_col, w2t, b2_s):
    k, m = x_cols.shape
    hf = w1t.shape[0]
    return pl.pallas_call(
        _policy_head_kernel,
        out_shape=jax.ShapeDtypeStruct((1, m), jnp.float32),
        grid=(1,),
        in_specs=[
            pl.BlockSpec((k, m), lambda i: (0, 0)),
            pl.BlockSpec((hf, k), lambda i: (0, 0)),
            pl.BlockSpec((hf, 1), lambda i: (0, 0)),
            pl.BlockSpec((1, hf), lambda i: (0, 0)),
            pl.BlockSpec(memory_space=pltpu.MemorySpace.SMEM),
        ],
        out_specs=pl.BlockSpec((1, m), lambda i: (0, 0)),
        compiler_params=pltpu.CompilerParams(dimension_semantics=("arbitrary",)),
    )(x_cols, w1t, b1_col, w2t, b2_s)


# ------------------------------- JAX glue ----------------------------------- #
def _im2col(x_nchw):
    """NCHW board -> (9*CIN, N*H*W) im2col matrix (zero 'SAME' padding).
    Rows: (tap, channel); columns: (batch, position) — positions lane-dense."""
    n, c, h, w = x_nchw.shape
    xp = jnp.pad(x_nchw, ((0, 0), (0, 0), (1, 1), (1, 1)))
    taps = [xp[:, :, ky:ky + h, kx:kx + w] for ky in range(3) for kx in range(3)]
    t = jnp.stack(taps, axis=0)                # (9, n, c, h, w)
    t = jnp.transpose(t, (0, 2, 1, 3, 4))      # (9, c, n, h, w)
    return t.reshape(9 * c, n * h * w)


def internal_model_pallas(x_nchw, params):
    """Stand-in internal model: 3x3 conv(SAME)+ReLU -> 1x1 conv -> flatten."""
    w1, b1, w2, b2 = params
    n = x_nchw.shape[0]
    x_cols = _im2col(x_nchw)                             # (36, n*HW)
    w1t = w1.reshape(9 * CIN, HID).T                     # (HID, 36)
    out = _run_policy_head(x_cols, w1t, b1.reshape(HID, 1), w2.T, b2.reshape(1))
    return out.reshape(n, HW)


def rotation_wrapper_pallas(x, params, export_mode=False):
    """(internal(x) + flip_dim1(internal(flip_dims23(x)))) / 2, with the 180-deg
    rotation folded into the conv weights so only one pass over x is needed."""
    if export_mode:
        return internal_model_pallas(x, params)
    w1, b1, w2, b2 = params
    n = x.shape[0]
    # flip(model(flip(x))) == model with rot-180 3x3 weights (tap t -> 8-t).
    w1f = jnp.concatenate([w1, w1[::-1]], axis=-1)       # (9, CIN, 2*HID)
    w1t = w1f.reshape(9 * CIN, 2 * HID).T                # (2*HID, 36)
    b1f = jnp.concatenate([b1, b1]).reshape(2 * HID, 1)  # (2*HID, 1)
    w2f = (0.5 * jnp.concatenate([w2, w2], axis=0)).T    # (1, 2*HID), avg folded in
    x_cols = _im2col(x)                                  # (36, n*HW)
    out = _run_policy_head(x_cols, w1t, b1f, w2f, b2.reshape(1))
    return out.reshape(n, HW)


# --------------------------- pure-JAX reference ----------------------------- #
def internal_model_ref(x_nchw, params):
    w1, b1, w2, b2 = params
    w1_hwio = w1.reshape(3, 3, CIN, HID)
    x_nhwc = jnp.transpose(x_nchw, (0, 2, 3, 1))
    h = lax.conv_general_dilated(
        x_nhwc, w1_hwio, (1, 1), "SAME",
        dimension_numbers=("NHWC", "HWIO", "NHWC"),
        precision=lax.Precision.HIGHEST)
    h = jnp.maximum(h + b1, 0.0)
    out = jnp.einsum("nhwc,co->nhwo", h, w2, precision=lax.Precision.HIGHEST) + b2
    return out.reshape(x_nchw.shape[0], HW)


def rotation_wrapper_ref(x, params):
    x_flip = jnp.flip(x, axis=(2, 3))
    y_flip = internal_model_ref(x_flip, params)
    y = jnp.flip(y_flip, axis=1)
    return (internal_model_ref(x, params) + y) / 2.0


# ---------------------------------- main ------------------------------------ #
if __name__ == "__main__":
    key = jax.random.PRNGKey(0)
    k1, k2, k3, k4, kx = jax.random.split(key, 5)
    w1 = jax.random.normal(k1, (9, CIN, HID), jnp.float32) * 0.1   # 3x3 conv
    b1 = jax.random.normal(k2, (HID,), jnp.float32) * 0.1
    w2 = jax.random.normal(k3, (HID, 1), jnp.float32) * 0.1        # 1x1 conv head
    b2 = jax.random.normal(k4, (1,), jnp.float32) * 0.1
    params = (w1, b1, w2, b2)

    x = jax.random.normal(kx, (BATCH, CIN, BOARD, BOARD), jnp.float32)

    fwd = jax.jit(rotation_wrapper_pallas, static_argnames=("export_mode",))

    out = jax.block_until_ready(fwd(x, params, export_mode=False))
    assert out.shape == (BATCH, BOARD * BOARD)
    ref = rotation_wrapper_ref(x, params)
    np.testing.assert_allclose(np.asarray(out), np.asarray(ref),
                               rtol=2e-3, atol=2e-3)

    # export_mode path (plain internal model, no rotation averaging)
    out_e = jax.block_until_ready(fwd(x, params, export_mode=True))
    ref_e = internal_model_ref(x, params)
    np.testing.assert_allclose(np.asarray(out_e), np.asarray(ref_e),
                               rtol=2e-3, atol=2e-3)

    print("KERNEL_OK")
</pallas_src>

<mosaic_0001>
module attributes {stable_mosaic.version = 11 : i64} {
  func.func @_policy_head_kernel(%arg0: i32, %arg1: memref<36x512xf32, #tpu.memory_space<vmem>>, %arg2: memref<64x36xf32, #tpu.memory_space<vmem>>, %arg3: memref<64x1xf32, #tpu.memory_space<vmem>>, %arg4: memref<1x64xf32, #tpu.memory_space<vmem>>, %arg5: memref<1xf32, #tpu.memory_space<smem>>, %arg6: memref<1x512xf32, #tpu.memory_space<vmem>>) attributes {dimension_semantics = [#tpu.dimension_semantics<arbitrary>], iteration_bounds = array<i64: 1>, scalar_prefetch = 0 : i64, scratch_operands = 0 : i64, tpu.core_type = #tpu.core_type<tc>, window_params = [{pipeline_mode = #tpu.pipeline_mode<synchronous>, transform_indices = @transform_0, window_bounds = array<i64: 36, 512>}, {pipeline_mode = #tpu.pipeline_mode<synchronous>, transform_indices = @transform_1, window_bounds = array<i64: 64, 36>}, {pipeline_mode = #tpu.pipeline_mode<synchronous>, transform_indices = @transform_2, window_bounds = array<i64: 64, 1>}, {pipeline_mode = #tpu.pipeline_mode<synchronous>, transform_indices = @transform_3, window_bounds = array<i64: 1, 64>}, {transform_indices = @transform_4, window_bounds = array<i64: 1>}, {pipeline_mode = #tpu.pipeline_mode<synchronous>, transform_indices = @transform_5, window_bounds = array<i64: 1, 512>}]} {
    %c0 = arith.constant 0 : index
    %c0_0 = arith.constant 0 : index
    %0 = vector.load %arg2[%c0, %c0_0] : memref<64x36xf32, #tpu.memory_space<vmem>>, vector<64x36xf32>
    %c0_1 = arith.constant 0 : index
    %c0_2 = arith.constant 0 : index
    %1 = vector.load %arg1[%c0_1, %c0_2] : memref<36x512xf32, #tpu.memory_space<vmem>>, vector<36x512xf32>
    %cst = arith.constant dense<0.000000e+00> : vector<64x512xf32>
    %2 = tpu.matmul %0, %1, %cst {dimension_numbers = #tpu.dot_dimension_numbers<[1], [0], [0], [1], [0, 0, 1, 1], [], []>} : vector<64x36xf32>, vector<36x512xf32>, vector<64x512xf32> -> vector<64x512xf32>
    %c0_3 = arith.constant 0 : index
    %c0_4 = arith.constant 0 : index
    %3 = vector.load %arg3[%c0_3, %c0_4] : memref<64x1xf32, #tpu.memory_space<vmem>>, vector<64x1xf32>
    %4 = vector.broadcast %3 : vector<64x1xf32> to vector<64x512xf32>
    %5 = arith.addf %2, %4 : vector<64x512xf32>
    %cst_5 = arith.constant 0.000000e+00 : f32
    %6 = vector.broadcast %cst_5 : f32 to vector<64x512xf32>
    %7 = arith.maximumf %5, %6 : vector<64x512xf32>
    %c0_6 = arith.constant 0 : index
    %c0_7 = arith.constant 0 : index
    %8 = vector.load %arg4[%c0_6, %c0_7] : memref<1x64xf32, #tpu.memory_space<vmem>>, vector<1x64xf32>
    %cst_8 = arith.constant dense<0.000000e+00> : vector<1x512xf32>
    %9 = tpu.matmul %8, %7, %cst_8 {dimension_numbers = #tpu.dot_dimension_numbers<[1], [0], [0], [1], [0, 0, 1, 1], [], []>} : vector<1x64xf32>, vector<64x512xf32>, vector<1x512xf32> -> vector<1x512xf32>
    %c0_9 = arith.constant 0 : index
    %10 = memref.load %arg5[%c0_9] : memref<1xf32, #tpu.memory_space<smem>>
    %11 = vector.broadcast %10 : f32 to vector<1x512xf32>
    %12 = arith.addf %9, %11 : vector<1x512xf32>
    %c0_10 = arith.constant 0 : index
    %c0_11 = arith.constant 0 : index
    %13 = vector.load %arg6[%c0_10, %c0_11] : memref<1x512xf32, #tpu.memory_space<vmem>>, vector<1x512xf32>
    tpu.vector_store %arg6[%c0_10, %c0_11], %12 {strides = array<i32>} : memref<1x512xf32, #tpu.memory_space<vmem>>, vector<1x512xf32>,
    return
  }
  func.func @transform_0(%arg0: i32) -> (i32, i32) {
    %c0_i32 = arith.constant 0 : i32
    %c0_i32_0 = arith.constant 0 : i32
    %c0_i32_1 = arith.constant 0 : i32
    return %c0_i32, %c0_i32_0 : i32, i32
  }
  func.func @transform_1(%arg0: i32) -> (i32, i32) {
    %c0_i32 = arith.constant 0 : i32
    %c0_i32_0 = arith.constant 0 : i32
    %c0_i32_1 = arith.constant 0 : i32
    return %c0_i32, %c0_i32_0 : i32, i32
  }
  func.func @transform_2(%arg0: i32) -> (i32, i32) {
    %c0_i32 = arith.constant 0 : i32
    %c0_i32_0 = arith.constant 0 : i32
    %c0_i32_1 = arith.constant 0 : i32
    return %c0_i32, %c0_i32_0 : i32, i32
  }
  func.func @transform_3(%arg0: i32) -> (i32, i32) {
    %c0_i32 = arith.constant 0 : i32
    %c0_i32_0 = arith.constant 0 : i32
    %c0_i32_1 = arith.constant 0 : i32
    return %c0_i32, %c0_i32_0 : i32, i32
  }
  func.func @transform_4(%arg0: i32) -> i32 {
    %c0_i32 = arith.constant 0 : i32
    %c0_i32_0 = arith.constant 0 : i32
    return %c0_i32 : i32
  }
  func.func @transform_5(%arg0: i32) -> (i32, i32) {
    %c0_i32 = arith.constant 0 : i32
    %c0_i32_0 = arith.constant 0 : i32
    %c0_i32_1 = arith.constant 0 : i32
    return %c0_i32, %c0_i32_0 : i32, i32
  }
}

</mosaic_0001>

<bundles_post_ra>
// kernel: rotation_wrapper_pallas.1
= control target key start
LH: loop header
LB: loop body
LE: loop exit
PB: predicated region body
PF: predicated region fallthrough
CT: control target
= control target key end

     0   :  { %vm122_vm0 = vcmask 1043456   ;;  %v485_v3 = vmov 0   ;;  %vm97_vm1 = vcmask 293888   ;;  %vm334_vm2 = vcmask 523264   ;;  %s714_s0 = inlined_call_operand.vmem [shape: f32[36,512], index: 0, kind: input, shape index: {}]   ;;  %s715_s1 = inlined_call_operand.vmem [shape: f32[64,36], index: 1, kind: input, shape index: {}]   ;;  %s716_s2 = inlined_call_operand.vmem [shape: f32[64,1], index: 2, kind: input, shape index: {}]   ;;  %s717_s3 = inlined_call_operand.vmem [shape: f32[1,64], index: 3, kind: input, shape index: {}]   ;;  %s718_s4 = inlined_call_operand.<no memory space> [shape: f32[1], index: 4, kind: input, shape index: {}]   ;;  %s719_s5 = inlined_call_operand.vmem [shape: f32[1,512], index: 5, kind: output, shape index: {}]  }
   0x1   :  { %v45_v0 = vld [vmem:[%s714_s0 + $0x80] sm:$0xf]  ;;  %v46_v1 = vld [vmem:[%s714_s0 + $0x88] sm:$0xf]  ;;  %v47_v2 = vld [vmem:[%s714_s0 + $0x90] sm:$0xf]  ;;  %483 = vset.pattern.permute.xlu1 %v485_v3  ;;  %482 = vset.pattern.permute.xlu0 %v485_v3 }
   0x2   :  { %441 = vmatpush.msk.msra.mxu0 %vm122_vm0, %v45_v0  ;;  %450 = vmatpush.msk.msra.mxu1 %vm122_vm0, %v46_v1  ;;  %v48_v4 = vld [vmem:[%s714_s0 + $0x98] sm:$0xf]  ;;  %v41_v5 = vld [vmem:[%s714_s0 + $0x60] sm:$0xff]  ;;  %v42_v6 = vld [vmem:[%s714_s0 + $0x68] sm:$0xff]  ;;  %vm425_vm3 = vcmask 1040384   ;;  %vm427_vm4 = vcmask 1042434  }
   0x3   :  { %459 = vmatpush.msk.msra.mxu2 %vm122_vm0, %v47_v2  ;;  %468 = vmatpush.msk.msra.mxu3 %vm122_vm0, %v48_v4  ;;  %v43_v7 = vld [vmem:[%s714_s0 + $0x70] sm:$0xff]  ;;  %v44_v8 = vld [vmem:[%s714_s0 + $0x78] sm:$0xff]  ;;  %v37_v9 = vld [vmem:[%s714_s0 + $0x40] sm:$0xff]  ;;  %vm429_vm5 = vcmask 1041408  }
   0x4   :  { %147 = vmatpush.msra.mxu0 %v41_v5  ;;  %188 = vmatpush.msra.mxu1 %v42_v6  ;;  %v38_v10 = vld [vmem:[%s714_s0 + $0x48] sm:$0xff]  ;;  %v39_v11 = vld [vmem:[%s714_s0 + $0x50] sm:$0xff]  ;;  %v40_v12 = vld [vmem:[%s714_s0 + $0x58] sm:$0xff] }
   0x5   :  { %229 = vmatpush.msra.mxu2 %v43_v7  ;;  %270 = vmatpush.msra.mxu3 %v44_v8  ;;  %v33_v13 = vld [vmem:[%s714_s0 + $0x20] sm:$0xff]  ;;  %v34_v14 = vld [vmem:[%s714_s0 + $0x28] sm:$0xff]  ;;  %v35_v15 = vld [vmem:[%s714_s0 + $0x30] sm:$0xff] }
   0x6   :  { %148 = vmatpush.msra.mxu0 %v37_v9  ;;  %189 = vmatpush.msra.mxu1 %v38_v10  ;;  %v36_v16 = vld [vmem:[%s714_s0 + $0x38] sm:$0xff]  ;;  %v29_v17 = vld [vmem:[%s714_s0] sm:$0xff]  ;;  %v30_v18 = vld [vmem:[%s714_s0 + $0x8] sm:$0xff] }
   0x7   :  { %230 = vmatpush.msra.mxu2 %v39_v11  ;;  %271 = vmatpush.msra.mxu3 %v40_v12  ;;  %v31_v19 = vld [vmem:[%s714_s0 + $0x10] sm:$0xff]  ;;  %v32_v20 = vld [vmem:[%s714_s0 + $0x18] sm:$0xff]  ;;  %v21_v21 = vld [vmem:[%s715_s1] sm:$0xff] }
   0x8   :  { %149 = vmatpush.msra.mxu0 %v33_v13  ;;  %190 = vmatpush.msra.mxu1 %v34_v14  ;;  %v54_v22 = vld [vmem:[%s716_s2 + $0x28] sm:$0xff]  ;;  %v56_v23 = vld [vmem:[%s716_s2 + $0x38] sm:$0xff]  ;;  %v53_v25 = vld [vmem:[%s716_s2 + $0x20] sm:$0xff] }
   0x9   :  { %231 = vmatpush.msra.mxu2 %v35_v15  ;;  %272 = vmatpush.msra.mxu3 %v36_v16  ;;  %v22_v24 = vld [vmem:[%s715_s1 + $0x8] sm:$0xff]  ;;  %v55_v26 = vld [vmem:[%s716_s2 + $0x30] sm:$0xff]  ;;  %v49_v28 = vld [vmem:[%s716_s2] sm:$0xff] }
   0xa   :  { %150 = vmatpush.msra.mxu0 %v29_v17  ;;  %191 = vmatpush.msra.mxu1 %v30_v18  ;;  %v23_v27 = vld [vmem:[%s715_s1 + $0x10] sm:$0xff]  ;;  %v50_v29 = vld [vmem:[%s716_s2 + $0x8] sm:$0xff]  ;;  %v52_v30 = vld [vmem:[%s716_s2 + $0x18] sm:$0xff] }
   0xb   :  { %232 = vmatpush.msra.mxu2 %v31_v19  ;;  %273 = vmatpush.msra.mxu3 %v32_v20  ;;  %v24_v31 = vld [vmem:[%s715_s1 + $0x18] sm:$0xff]  ;;  %v51_v32 = vld [vmem:[%s716_s2 + $0x10] sm:$0xff]  ;;  %v25_v33 = vld [vmem:[%s715_s1 + $0x20] sm:$0xff] }
   0xc   :  { %442 = vmatmul.msk.f32.vlgmr.msra.gmra.mxu0 %vm97_vm1, %v21_v21  ;;  %451 = vmatmul.msk.f32.vlgmr.msra.gmra.mxu1 %vm97_vm1, %v21_v21  ;;  %v26_v34 = vld [vmem:[%s715_s1 + $0x28] sm:$0xff]  ;;  %v27_v35 = vld [vmem:[%s715_s1 + $0x30] sm:$0xff]  ;;  %v28_v36 = vld [vmem:[%s715_s1 + $0x38] sm:$0xff] }
   0xd   :  { %460 = vmatmul.msk.f32.vlgmr.msra.gmra.mxu2 %vm97_vm1, %v21_v21  ;;  %469 = vmatmul.msk.f32.vlgmr.msra.gmra.mxu3 %vm97_vm1, %v21_v21 }
   0xe   :  { %84 = vperm.xlu1 %483, %v54_v22   ;;  %94 = vperm.xlu0 %482, %v56_v23  }
   0xf   :  { %484 = vset.pattern.permute.xlu2 %v485_v3 }
  0x10   :  { %74 = vperm.xlu2 %484, %v52_v30  }
  0x14   :  { %443 = vmatmul.msk.f32.gmra.mxu0 %vm97_vm1, %v22_v24  ;;  %452 = vmatmul.msk.f32.gmra.mxu1 %vm97_vm1, %v22_v24 }
  0x15   :  { %461 = vmatmul.msk.f32.gmra.mxu2 %vm97_vm1, %v22_v24  ;;  %470 = vmatmul.msk.f32.gmra.mxu3 %vm97_vm1, %v22_v24 }
  0x16   :  { %79 = vperm.xlu1 %483, %v53_v25   ;;  %89 = vperm.xlu0 %482, %v55_v26  }
  0x18   :  { %69 = vperm.xlu2 %484, %v51_v32  }
  0x1c   :  { %444 = vmatmul.msk.f32.gmra.mxu0 %vm97_vm1, %v23_v27  ;;  %453 = vmatmul.msk.f32.gmra.mxu1 %vm97_vm1, %v23_v27 }
  0x1d   :  { %462 = vmatmul.msk.f32.gmra.mxu2 %vm97_vm1, %v23_v27  ;;  %471 = vmatmul.msk.f32.gmra.mxu3 %vm97_vm1, %v23_v27 }
  0x1e   :  { %59 = vperm.xlu1 %483, %v49_v28   ;;  %64 = vperm.xlu0 %482, %v50_v29  }
  0x24   :  { %445 = vmatmul.msk.f32.gmra.mxu0 %vm97_vm1, %v24_v31  ;;  %454 = vmatmul.msk.f32.gmra.mxu1 %vm97_vm1, %v24_v31 }
  0x25   :  { %463 = vmatmul.msk.f32.gmra.mxu2 %vm97_vm1, %v24_v31  ;;  %472 = vmatmul.msk.f32.gmra.mxu3 %vm97_vm1, %v24_v31 }
  0x2c   :  { %446 = vmatmul.msk.f32.gmra.mxu0 %vm97_vm1, %v25_v33  ;;  %455 = vmatmul.msk.f32.gmra.mxu1 %vm97_vm1, %v25_v33 }
  0x2d   :  { %464 = vmatmul.msk.f32.gmra.mxu2 %vm97_vm1, %v25_v33  ;;  %473 = vmatmul.msk.f32.gmra.mxu3 %vm97_vm1, %v25_v33 }
  0x34   :  { %447 = vmatmul.msk.f32.gmra.mxu0 %vm97_vm1, %v26_v34  ;;  %456 = vmatmul.msk.f32.gmra.mxu1 %vm97_vm1, %v26_v34 }
  0x35   :  { %465 = vmatmul.msk.f32.gmra.mxu2 %vm97_vm1, %v26_v34  ;;  %474 = vmatmul.msk.f32.gmra.mxu3 %vm97_vm1, %v26_v34 }
  0x3c   :  { %448 = vmatmul.msk.f32.gmra.mxu0 %vm97_vm1, %v27_v35  ;;  %457 = vmatmul.msk.f32.gmra.mxu1 %vm97_vm1, %v27_v35 }
  0x3d   :  { %466 = vmatmul.msk.f32.gmra.mxu2 %vm97_vm1, %v27_v35  ;;  %475 = vmatmul.msk.f32.gmra.mxu3 %vm97_vm1, %v27_v35 }
  0x44   :  { %449 = vmatmul.msk.f32.gmra.mxu0 %vm97_vm1, %v28_v36  ;;  %458 = vmatmul.msk.f32.gmra.mxu1 %vm97_vm1, %v28_v36 }
  0x45   :  { %467 = vmatmul.msk.f32.gmra.mxu2 %vm97_vm1, %v28_v36  ;;  %476 = vmatmul.msk.f32.gmra.mxu3 %vm97_vm1, %v28_v36 }
  0x6a   :  { %v682_v1 = vpop.permute.xlu2 %74 }
  0x72   :  { %v70_v23 = vpop.permute.xlu2 %69 }
  0x80   :  { %v95_v59 = vpop.permute.xlu0 %94  ;;  %v85_v60 = vpop.permute.xlu1 %84 }
  0x88   :  { %v90_v2 = vpop.permute.xlu0 %89  ;;  %v80_v9 = vpop.permute.xlu1 %79 }
  0x89   :  { %v656_v37 = vpop.f32.mrf.mxu0  ;;  %v658_v38 = vpop.f32.mrf.mxu1 }
  0x90   :  { %v660_v39 = vpop.f32.mrf.mxu2  ;;  %v662_v40 = vpop.f32.mrf.mxu3 }
  0x91   :  { %v664_v41 = vpop.f32.mrf.mxu0  ;;  %v666_v42 = vpop.f32.mrf.mxu1 }
  0x92   :  { %v65_v33 = vpop.permute.xlu0 %64 }
  0x98   :  { %v668_v43 = vpop.f32.mrf.mxu2  ;;  %v670_v44 = vpop.f32.mrf.mxu3 }
  0x99   :  { %v158_v45 = vpop.f32.mrf.mxu0  ;;  %v199_v46 = vpop.f32.mrf.mxu1 }
  0x9a   :  { %v159_v32 = vadd.f32 %v158_v45, %v70_v23  ;;  %v197_v45 = vadd.f32 %v666_v42, %v65_v33 }
  0xa0   :  { %v672_v47 = vpop.f32.mrf.mxu2  ;;  %v674_v48 = vpop.f32.mrf.mxu3 }
  0xa1   :  { %v161_v49 = vpop.f32.mrf.mxu0  ;;  %v202_v50 = vpop.f32.mrf.mxu1 }
  0xa2   :  { %v162_v20 = vadd.f32 %v161_v49, %v682_v1  ;;  %v203_v24 = vadd.f32 %v202_v50, %v682_v1  ;;  %v200_v49 = vadd.f32 %v199_v46, %v70_v23  ;;  %v156_v50 = vadd.f32 %v664_v41, %v65_v33 }
  0xa3   :  { %v307_v46 = vmax.f32 %v159_v32, 0.0 }
  0xa8   :  { %v676_v51 = vpop.f32.mrf.mxu2  ;;  %v678_v52 = vpop.f32.mrf.mxu3 }
  0xa9   :  { %v164_v53 = vpop.f32.mrf.mxu0  ;;  %v205_v54 = vpop.f32.mrf.mxu1  ;;  %v285_v42 = vadd.f32 %v678_v52, %v682_v1 }
  0xaa   :  { %v165_v16 = vadd.f32 %v164_v53, %v80_v9  ;;  %v206_v18 = vadd.f32 %v205_v54, %v80_v9  ;;  %v311_v53 = vmax.f32 %v162_v20, 0.0 }
  0xac   :  { %v315_v29 = vmax.f32 %v165_v16, 0.0  ;;  %v316_v34 = vmax.f32 %v206_v18, 0.0 }
  0xb0   :  { %v246_v55 = vpop.f32.mrf.mxu2  ;;  %v680_v56 = vpop.f32.mrf.mxu3 }
  0xb1   :  { %v167_v57 = vpop.f32.mrf.mxu0  ;;  %v208_v58 = vpop.f32.mrf.mxu1 }
  0xb2   :  { %v168_v12 = vadd.f32 %v167_v57, %v85_v60  ;;  %v209_v14 = vadd.f32 %v208_v58, %v85_v60  ;;  %v60_v58 = vpop.permute.xlu1 %59 }
  0xb4   :  { %v319_v21 = vmax.f32 %v168_v12, 0.0  ;;  %v320_v25 = vmax.f32 %v209_v14, 0.0 }
  0xb8   :  { %v249_v61 = vpop.f32.mrf.mxu2  ;;  %v290_v62 = vpop.f32.mrf.mxu3 }
  0xb9   :  { %v170_v63 = vpop.f32.mrf.mxu0  ;;  %v211_v0 = vpop.f32.mrf.mxu1  ;;  %v250_v35 = vadd.f32 %v249_v61, %v85_v60  ;;  %v291_v54 = vadd.f32 %v290_v62, %v85_v60  ;;  %v153_v60 = vadd.f32 %v656_v37, %v60_v58  ;;  %v244_v62 = vadd.f32 %v676_v51, %v682_v1 }
  0xba   :  { %v171_v6 = vadd.f32 %v170_v63, %v90_v2  ;;  %v212_v10 = vadd.f32 %v211_v0, %v90_v2  ;;  %v312_v63 = vmax.f32 %v203_v24, 0.0  ;;  %v247_v0 = vadd.f32 %v246_v55, %v80_v9 }
  0xbb   :  { %v321_v41 = vmax.f32 %v250_v35, 0.0  ;;  %v308_v55 = vmax.f32 %v200_v49, 0.0  ;;  %v304_v37 = vmax.f32 %v197_v45, 0.0  ;;  %v282_v51 = vadd.f32 %v674_v48, %v70_v23  ;;  %v331_v48 = vld [vmem:[%s717_s3] sm:$0x1] }
  0xbc   :  { %v323_v17 = vmax.f32 %v171_v6, 0.0  ;;  %v324_v19 = vmax.f32 %v212_v10, 0.0  ;;  %v317_v6 = vmax.f32 %v247_v0, 0.0  ;;  %v279_v1 = vadd.f32 %v670_v44, %v65_v33 }
  0xbd   :  { %v314_v10 = vmax.f32 %v285_v42, 0.0  ;;  %v310_v12 = vmax.f32 %v282_v51, 0.0 }
  0xc0   :  { %v252_v3 = vpop.f32.mrf.mxu2  ;;  %v293_v4 = vpop.f32.mrf.mxu3 }
  0xc1   :  { %v173_v5 = vpop.f32.mrf.mxu0  ;;  %v214_v8 = vpop.f32.mrf.mxu1  ;;  %v253_v26 = vadd.f32 %v252_v3, %v90_v2  ;;  %v294_v30 = vadd.f32 %v293_v4, %v90_v2  ;;  %v194_v2 = vadd.f32 %v658_v38, %v60_v58  ;;  %v322_v4 = vmax.f32 %v291_v54, 0.0 }
  0xc2   :  { %v174_v7 = vadd.f32 %v173_v5, %v95_v59  ;;  %v215_v11 = vadd.f32 %v214_v8, %v95_v59  ;;  %v241_v5 = vadd.f32 %v672_v47, %v70_v23  ;;  %v299_v8 = vmax.f32 %v153_v60, 0.0 }
  0xc3   :  { %v325_v3 = vmax.f32 %v253_v26, 0.0  ;;  %v326_v61 = vmax.f32 %v294_v30, 0.0  ;;  %v238_v38 = vadd.f32 %v668_v43, %v65_v33  ;;  %v300_v52 = vmax.f32 %v194_v2, 0.0 }
  0xc4   :  { %v327_v13 = vmax.f32 %v174_v7, 0.0  ;;  %v328_v15 = vmax.f32 %v215_v11, 0.0  ;;  %v235_v47 = vadd.f32 %v660_v39, %v60_v58  ;;  %v309_v11 = vmax.f32 %v241_v5, 0.0 }
  0xc5   :  { %v276_v43 = vadd.f32 %v662_v40, %v60_v58  ;;  %v305_v44 = vmax.f32 %v238_v38, 0.0  ;;  %v333_v40 = vstv %s718_s4  ;;  %v432_v23 = vlaneseq }
  0xc6   :  { %346 = vmatpush.msrb.mxu0 %v327_v13  ;;  %366 = vmatpush.msrb.mxu1 %v328_v15  ;;  %v306_v13 = vmax.f32 %v279_v1, 0.0  ;;  %v301_v39 = vmax.f32 %v235_v47, 0.0 }
  0xc7   :  { %v302_v14 = vmax.f32 %v276_v43, 0.0  ;;  %vm434_vm6 = vcmp.lt.s32.totalorder %v432_v23, 512 }
  0xc8   :  { %v255_v22 = vpop.f32.mrf.mxu2  ;;  %347 = vmatpush.msrb.mxu0 %v323_v17  ;;  %v296_v28 = vpop.f32.mrf.mxu3  ;;  %367 = vmatpush.msrb.mxu1 %v324_v19 }
  0xc9   :  { %v256_v27 = vadd.f32 %v255_v22, %v95_v59  ;;  %v297_v31 = vadd.f32 %v296_v28, %v95_v59  ;;  %v288_v59 = vadd.f32 %v680_v56, %v80_v9  ;;  %v303_v56 = vmax.f32 %v156_v50, 0.0 }
  0xca   :  { %348 = vmatpush.msrb.mxu0 %v319_v21  ;;  %368 = vmatpush.msrb.mxu1 %v320_v25  ;;  %v313_v9 = vmax.f32 %v244_v62, 0.0 }
  0xcb   :  { %v329_v36 = vmax.f32 %v256_v27, 0.0  ;;  %v330_v57 = vmax.f32 %v297_v31, 0.0  ;;  %v318_v7 = vmax.f32 %v288_v59, 0.0 }
  0xcc   :  { %349 = vmatpush.msrb.mxu0 %v315_v29  ;;  %369 = vmatpush.msrb.mxu1 %v316_v34 }
  0xcd   :  { %386 = vmatpush.msrb.mxu2 %v329_v36  ;;  %406 = vmatpush.msrb.mxu3 %v330_v57 }
  0xce   :  { %350 = vmatpush.msrb.mxu0 %v311_v53  ;;  %370 = vmatpush.msrb.mxu1 %v312_v63 }
  0xcf   :  { %387 = vmatpush.msrb.mxu2 %v325_v3  ;;  %407 = vmatpush.msrb.mxu3 %v326_v61 }
  0xd0   :  { %351 = vmatpush.msrb.mxu0 %v307_v46  ;;  %371 = vmatpush.msrb.mxu1 %v308_v55 }
  0xd1   :  { %388 = vmatpush.msrb.mxu2 %v321_v41  ;;  %408 = vmatpush.msrb.mxu3 %v322_v4 }
  0xd2   :  { %352 = vmatpush.msrb.mxu0 %v303_v56  ;;  %372 = vmatpush.msrb.mxu1 %v304_v37 }
  0xd3   :  { %389 = vmatpush.msrb.mxu2 %v317_v6  ;;  %409 = vmatpush.msrb.mxu3 %v318_v7 }
  0xd4   :  { %353 = vmatpush.msrb.mxu0 %v299_v8  ;;  %373 = vmatpush.msrb.mxu1 %v300_v52 }
  0xd5   :  { %390 = vmatpush.msrb.mxu2 %v313_v9  ;;  %410 = vmatpush.msrb.mxu3 %v314_v10 }
  0xd6   :  { %478 = vmatmul.msk.f32.vlgmr.msrb.gmra.mxu1 %vm334_vm2, %v331_v48  ;;  %477 = vmatmul.msk.f32.vlgmr.msrb.gmra.mxu0 %vm334_vm2, %v331_v48 }
  0xd7   :  { %391 = vmatpush.msrb.mxu2 %v309_v11  ;;  %411 = vmatpush.msrb.mxu3 %v310_v12 }
  0xd9   :  { %392 = vmatpush.msrb.mxu2 %v305_v44  ;;  %412 = vmatpush.msrb.mxu3 %v306_v13 }
  0xdb   :  { %393 = vmatpush.msrb.mxu2 %v301_v39  ;;  %413 = vmatpush.msrb.mxu3 %v302_v14 }
  0xdc   :  { %479 = vmatmul.msk.f32.vlgmr.msrb.gmra.mxu2 %vm334_vm2, %v331_v48  ;;  %480 = vmatmul.msk.f32.vlgmr.msrb.gmra.mxu3 %vm334_vm2, %v331_v48 }
 0x153   :  { %v375_v15 = vpop.f32.mrf.mxu1  ;;  %v355_v17 = vpop.f32.mrf.mxu0 }
 0x154   :  { %v376_v16 = vadd.f32 %v375_v15, %v333_v40  ;;  %v356_v20 = vadd.f32 %v355_v17, %v333_v40 }
 0x156   :  { %v422_v18 = vrot.slane %v376_v16, 7 }
 0x158   :  { %v426_v27 = vsel %vm425_vm3, %v356_v20, %v422_v18 }
 0x15f   :  { %v395_v19 = vpop.f32.mrf.mxu2  ;;  %v415_v22 = vpop.f32.mrf.mxu3 }
 0x160   :  { %v396_v21 = vadd.f32 %v395_v19, %v333_v40  ;;  %v416_v24 = vadd.f32 %v415_v22, %v333_v40 }
 0x162   :  { %v423_v25 = vrot.slane %v396_v21, 6  ;;  %v424_v26 = vrot.slane %v416_v24, 5 }
 0x164   :  { %v428_v28 = vsel %vm427_vm4, %v423_v25, %v424_v26 }
 0x165   :  { %v430_v29 = vsel %vm429_vm5, %v426_v27, %v428_v28 }
 0x166   :  { %436 = vst.msk [vmem:[%s719_s5] sm:$0xf] %vm434_vm6, %v430_v29 }

</bundles_post_ra>
